<compile_context>
chip_gen: v6e
topology: v6e:2x2x1
jax: 0.10.0
libtpu: 0.0.40
codegen_flags: <defaults>
</compile_context>

<pallas_src>
import functools

import numpy as np
import jax
import jax.numpy as jnp
from jax.experimental import pallas as pl
from jax.experimental.pallas import tpu as pltpu


def _round_up(a, b):
    return (a + b - 1) // b * b


def _conv_bn_relu_kernel(x_hbm, w_ref, bias_ref, mask_ref, o_ref,
                         win_ref, sem_ref, acc_ref, *,
                         KH, KW, W_row, L, pad_w, row_stride, n_hb,
                         apply_relu, split_kh):
    # x_hbm   : (N, Cin_pad, L_flat_pad) in HBM (row-flattened, zero padded)
    # w_ref   : (Cout_pad, K) or (KH, Cout_pad, KW*Cin_pad); BN scale folded in
    # bias_ref: (Cout_pad, 1) f32 folded BatchNorm bias
    # mask_ref: (KW, 1, L)  1.0 where column j + kw - pad_w is a valid column
    # o_ref   : (1, Cout_pad, L)   L = lane-padded tH*W_out (lane-dense)
    # win_ref : (2, Cin_pad, L_big_pad) VMEM halo-window double buffer
    # sem_ref : DMA semaphores (2,)
    # acc_ref : (Cout_pad, L) f32 accumulator (used on the split-kh path)
    n = pl.program_id(0)
    h = pl.program_id(1)
    slot = h % 2
    win_len = win_ref.shape[2]

    def fetch(hh, s):
        pltpu.make_async_copy(
            x_hbm.at[n, :, pl.ds(hh * row_stride, win_len)],
            win_ref.at[s], sem_ref.at[s]).start()

    # First row block of this image: fetch synchronously (self-initializing,
    # so splitting the batch axis across cores stays correct).
    @pl.when(h == 0)
    def _():
        fetch(0, 0)

    # Wait for the current window (started above or as last step's prefetch).
    pltpu.make_async_copy(
        x_hbm.at[n, :, pl.ds(0, win_len)],
        win_ref.at[slot], sem_ref.at[slot]).wait()

    # Prefetch the next row block of the same image into the other buffer.
    if n_hb > 1:
        @pl.when(h + 1 < n_hb)
        def _():
            fetch(h + 1, 1 - slot)

    cur = win_ref.at[slot]

    def taps(kh):
        pieces = []
        for kw in range(KW):
            # The flattened rows are W_row-contiguous, so the (kh, kw) tap is
            # just a static lane offset into the halo window.
            piece = cur[:, pl.ds(kh * W_row + kw, L)]        # (Cin_pad, L)
            if kw != pad_w:
                # Horizontally shifted taps: zero lanes that wrapped into the
                # neighbouring image row.
                piece = piece * mask_ref[kw]                 # (1, L) bcast
            pieces.append(piece)
        return pieces

    if split_kh:
        # Large K: per-kh contraction into a VMEM accumulator bounds the live
        # im2col footprint to KW*Cin_pad rows.
        for kh in range(KH):
            p = taps(kh)
            cols = p[0] if KW == 1 else jnp.concatenate(p, axis=0)
            part = jnp.dot(w_ref[kh], cols, preferred_element_type=jnp.float32)
            if kh == 0:
                acc_ref[...] = part
            else:
                acc_ref[...] += part
        acc = acc_ref[...]
    else:
        # Small K: one MXU matmul per grid step.
        pieces = []
        for kh in range(KH):
            pieces.extend(taps(kh))
        cols = pieces[0] if len(pieces) == 1 else jnp.concatenate(pieces, axis=0)
        acc = jnp.dot(w_ref[...], cols, preferred_element_type=jnp.float32)

    y = acc + bias_ref[...]                                  # folded BN bias
    if apply_relu:
        y = jnp.maximum(y, 0.0)
    o_ref[0] = y.astype(o_ref.dtype)


def _pick_row_tile(H_out, W_out, Cin_pad, Cout_pad, K_step, KH, KW,
                   in_itemsize, out_itemsize, vmem_budget):
    """Choose the row tile: prefer 128-multiple lane widths within VMEM budget."""
    per_lane = (2 * Cin_pad * in_itemsize        # double-buffered halo window
                + K_step * in_itemsize           # live im2col columns
                + Cout_pad * 4                   # f32 accumulator
                + 2 * Cout_pad * out_itemsize    # double-buffered output block
                + 2 * KW * in_itemsize)          # masks
    fixed = 2 * Cout_pad * KH * KW * Cin_pad * in_itemsize + (1 << 20)
    avail = max(vmem_budget - fixed, 256 * per_lane)
    max_L = min(16384, max(128, (avail // per_lane) // 128 * 128))

    aligned = [t for t in range(1, H_out + 1)
               if (t * W_out) % 128 == 0 and t * W_out <= max_L]
    if aligned:
        divs = [t for t in aligned if H_out % t == 0]
        return max(divs) if divs else max(aligned)
    # No naturally 128-aligned tile: the lane width gets padded to 128
    # downstream (tail columns discarded), so just size from the budget.
    return max(1, min(H_out, max_L // max(W_out, 1)))


def basic_cconv(x_nchw, weight_oihw, bn_gamma, bn_beta, bn_mean, bn_var, *,
                stride=1, padding=0, dilation=1, groups=1, eps=1e-5, relu=True,
                row_tile=None, compute_dtype=None):
    """BasicCConv forward (bn=True branch): conv(bias=False) + BN(eval) + ReLU."""
    N, Cin, H, W = x_nchw.shape
    Cout, _, KH, KW = weight_oihw.shape

    # TODO(synk): only stride=1 / dilation=1 / groups=1 "same-width" convs
    # (2*padding == k-1: the standard 1x1/p0 and 3x3/p1 BasicCConv configs) are
    # implemented; other configs need a generic fallback kernel.
    assert stride == 1 and dilation == 1 and groups == 1, "unsupported config"
    assert 2 * padding == KW - 1 and 2 * padding == KH - 1, "unsupported padding"

    P = padding
    H_out, W_out = H, W

    x_dtype = x_nchw.dtype
    cdt = jnp.dtype(jnp.bfloat16) if compute_dtype is None else jnp.dtype(compute_dtype)
    in_it = cdt.itemsize
    out_it = jnp.dtype(x_dtype).itemsize

    # Sublane packing: f32 -> 8, bf16 -> 16, int8/fp8 -> 32.
    pack = 8 * max(1, 4 // in_it)
    Cin_pad = _round_up(Cin, pack)
    Cout_pad = _round_up(Cout, 8)
    K = KH * KW * Cin_pad
    split_kh = K > 512
    K_step = KW * Cin_pad if split_kh else K

    try:
        vmem_cap = int(pltpu.get_tpu_info().vmem_capacity_bytes)
    except Exception:
        vmem_cap = 64 << 20

    if row_tile is not None:
        tH = max(1, min(int(row_tile), H_out))
    else:
        tH = _pick_row_tile(H_out, W_out, Cin_pad, Cout_pad, K_step, KH, KW,
                            in_it, out_it, int(vmem_cap * 0.6))
    n_hb = -(-H_out // tH)                       # row tile need not divide H_out
    L_comp = _round_up(tH * W_out, 128)          # lane-dense, 128-multiple width
    row_stride = tH * W
    L_big = L_comp + (KH - 1) * W + (KW - 1)     # halo window length
    L_big_pad = _round_up(L_big, 128)

    # ---- Row-flattened, zero-padded input (one copy; stays in HBM). ----
    left = P * W + P
    L_flat = (H + 2 * P) * W + (KW - 1)
    L_flat_pad = _round_up(max(L_flat, (n_hb - 1) * row_stride + L_big_pad), 128)
    x_flat = jnp.zeros((N, Cin_pad, L_flat_pad), cdt)
    x_flat = jax.lax.dynamic_update_slice(
        x_flat, x_nchw.reshape(N, Cin, H * W).astype(cdt), (0, 0, left))

    # ---- Weights with BN scale folded in (inference semantics). ----
    scale_v = (bn_gamma / jnp.sqrt(bn_var + eps)).astype(jnp.float32)
    w_scaled = weight_oihw.astype(jnp.float32) * scale_v[:, None, None, None]
    w_pad = jnp.pad(w_scaled,
                    ((0, Cout_pad - Cout), (0, Cin_pad - Cin), (0, 0), (0, 0)))
    if split_kh:
        w_mat = jnp.transpose(w_pad, (2, 0, 3, 1)).reshape(
            KH, Cout_pad, KW * Cin_pad).astype(cdt)
        w_spec = pl.BlockSpec((KH, Cout_pad, KW * Cin_pad), lambda n, h: (0, 0, 0))
    else:
        w_mat = jnp.transpose(w_pad, (0, 2, 3, 1)).reshape(Cout_pad, K).astype(cdt)
        w_spec = pl.BlockSpec((Cout_pad, K), lambda n, h: (0, 0))

    bias_v = bn_beta.astype(jnp.float32) - bn_mean.astype(jnp.float32) * scale_v
    bias = jnp.pad(bias_v, (0, Cout_pad - Cout)).reshape(Cout_pad, 1)

    # ---- Column-border masks (precomputed; no per-step iota / int mod). ----
    cols_np = np.arange(L_comp) % W_out
    masks_np = np.stack(
        [((cols_np + kw - P >= 0) & (cols_np + kw - P < W_out)) for kw in range(KW)],
        axis=0).astype(np.float32).reshape(KW, 1, L_comp)
    masks = jnp.asarray(masks_np, cdt)

    kernel = functools.partial(
        _conv_bn_relu_kernel, KH=KH, KW=KW, W_row=W, L=L_comp, pad_w=P,
        row_stride=row_stride, n_hb=n_hb, apply_relu=relu, split_kh=split_kh)

    # Per-step VMEM footprint (window 2x, weights/bias/masks 2x pipeline
    # buffers, accumulator, live cols, output 2x) with ~30% headroom.
    need = (2 * Cin_pad * L_big_pad * in_it
            + 2 * int(w_mat.size) * in_it
            + 2 * int(bias.size) * 4
            + 2 * int(masks.size) * in_it
            + Cout_pad * L_comp * 4
            + K_step * L_comp * in_it
            + 2 * Cout_pad * L_comp * out_it)
    vmem_limit = int(min(vmem_cap * 0.9, max(need * 1.3, 32 << 20)))

    flops = 2 * N * H_out * W_out * Cout * KH * KW * Cin
    bytes_accessed = int(x_flat.size) * in_it + int(w_mat.size) * in_it \
        + N * Cout_pad * n_hb * L_comp * out_it

    out_flat = pl.pallas_call(
        kernel,
        out_shape=jax.ShapeDtypeStruct((N, Cout_pad, n_hb * L_comp), x_dtype),
        grid_spec=pltpu.PrefetchScalarGridSpec(
            num_scalar_prefetch=0,
            grid=(N, n_hb),
            in_specs=[
                pl.BlockSpec(memory_space=pl.ANY),                   # x_flat in HBM
                w_spec,
                pl.BlockSpec((Cout_pad, 1), lambda n, h: (0, 0)),
                pl.BlockSpec((KW, 1, L_comp), lambda n, h: (0, 0, 0)),
            ],
            out_specs=pl.BlockSpec((1, Cout_pad, L_comp), lambda n, h: (n, 0, h)),
            scratch_shapes=[
                pltpu.VMEM((2, Cin_pad, L_big_pad), cdt),            # halo window
                pltpu.SemaphoreType.DMA((2,)),
                pltpu.VMEM((Cout_pad, L_comp), jnp.float32),         # f32 accumulator
            ]),
        compiler_params=pltpu.CompilerParams(
            dimension_semantics=("parallel", "arbitrary"),
            vmem_limit_bytes=vmem_limit),
        cost_estimate=pl.CostEstimate(
            flops=flops, transcendentals=0, bytes_accessed=int(bytes_accessed)),
    )(x_flat, w_mat, bias, masks)

    # Strip lane / channel / row padding; for exact tilings these are no-ops.
    out = out_flat.reshape(N, Cout_pad, n_hb, L_comp)[:, :Cout, :, :tH * W_out]
    out = out.reshape(N, Cout, n_hb * tH, W_out)[:, :, :H_out, :]
    return out


def _reference(x_nchw, weight_oihw, bn_gamma, bn_beta, bn_mean, bn_var, *,
               stride, padding, eps, relu):
    y = jax.lax.conv_general_dilated(
        x_nchw, weight_oihw,
        window_strides=(stride, stride),
        padding=[(padding, padding), (padding, padding)],
        dimension_numbers=('NCHW', 'OIHW', 'NCHW'))
    scale = bn_gamma / jnp.sqrt(bn_var + eps)
    bias = bn_beta - bn_mean * scale
    y = y * scale[None, :, None, None] + bias[None, :, None, None]
    if relu:
        y = jnp.maximum(y, 0.0)
    return y


if __name__ == "__main__":
    def run_case(key, *, N, Cin, H, W, Cout, k, stride, padding, relu,
                 row_tile, compute_dtype, tol):
        k_x, k_w, k_g, k_b, k_m, k_v = jax.random.split(key, 6)
        x = jax.random.normal(k_x, (N, Cin, H, W), jnp.float32)
        weight = jax.random.normal(k_w, (Cout, Cin, k, k), jnp.float32) * 0.1
        gamma = 0.5 + jax.random.uniform(k_g, (Cout,), jnp.float32)
        beta = 0.1 * jax.random.normal(k_b, (Cout,), jnp.float32)
        mean = 0.1 * jax.random.normal(k_m, (Cout,), jnp.float32)
        var = 0.5 + jax.random.uniform(k_v, (Cout,), jnp.float32)

        out = basic_cconv(x, weight, gamma, beta, mean, var,
                          stride=stride, padding=padding, relu=relu,
                          row_tile=row_tile, compute_dtype=compute_dtype)
        out = jax.block_until_ready(out)
        ref = _reference(x, weight, gamma, beta, mean, var,
                         stride=stride, padding=padding, eps=1e-5, relu=relu)
        assert out.shape == ref.shape, (out.shape, ref.shape)
        err = float(jnp.max(jnp.abs(out - ref)))
        assert jnp.allclose(out, ref, atol=tol, rtol=tol), err

    key = jax.random.PRNGKey(0)
    k1, k2, k3, k4 = jax.random.split(key, 4)

    # BasicCConv(4, 8, kernel_size=3, stride=1, padding=1, relu=True, bn=True)
    # bf16 compute, two row blocks of 128 lanes -> exercises the DMA prefetch.
    run_case(k1, N=2, Cin=4, H=16, W=16, Cout=8, k=3, stride=1, padding=1,
             relu=True, row_tile=8, compute_dtype=None, tol=5e-2)

    # BasicCConv(4, 16, kernel_size=1, stride=1, padding=0, relu=False, bn=True)
    # bf16 compute, auto row tile (single block).
    run_case(k2, N=2, Cin=4, H=16, W=16, Cout=16, k=1, stride=1, padding=0,
             relu=False, row_tile=None, compute_dtype=None, tol=5e-2)

    # f32 exact-math check of the lane-padded path (tH*W_out = 64 -> L = 128).
    run_case(k3, N=1, Cin=4, H=16, W=16, Cout=8, k=3, stride=1, padding=1,
             relu=True, row_tile=4, compute_dtype=jnp.float32, tol=2e-4)

    # f32 exact-math check of non-divisor row tile + Cin/Cout padding.
    run_case(k4, N=1, Cin=3, H=12, W=16, Cout=10, k=3, stride=1, padding=1,
             relu=False, row_tile=8, compute_dtype=jnp.float32, tol=2e-4)

    print("KERNEL_OK")
</pallas_src>

<mosaic_0001>
module attributes {stable_mosaic.version = 11 : i64} {
  func.func @_conv_bn_relu_kernel(%arg0: i32, %arg1: i32, %arg2: memref<2x16x384xbf16, #tpu.memory_space<any>>, %arg3: memref<8x144xbf16, #tpu.memory_space<vmem>>, %arg4: memref<8x1xf32, #tpu.memory_space<vmem>>, %arg5: memref<3x1x128xbf16, #tpu.memory_space<vmem>>, %arg6: memref<1x8x128xf32, #tpu.memory_space<vmem>>, %arg7: memref<2x16x256xbf16, #tpu.memory_space<vmem>>, %arg8: memref<2x!tpu.dma_semaphore, #tpu.memory_space<semaphore_mem>>, %arg9: memref<8x128xf32, #tpu.memory_space<vmem>>) attributes {dimension_semantics = [#tpu.dimension_semantics<parallel>, #tpu.dimension_semantics<arbitrary>], iteration_bounds = array<i64: 2, 2>, scalar_prefetch = 0 : i64, scratch_operands = 3 : i64, tpu.core_type = #tpu.core_type<tc>, window_params = [{}, {pipeline_mode = #tpu.pipeline_mode<synchronous>, transform_indices = @transform_1, window_bounds = array<i64: 8, 144>}, {pipeline_mode = #tpu.pipeline_mode<synchronous>, transform_indices = @transform_2, window_bounds = array<i64: 8, 1>}, {pipeline_mode = #tpu.pipeline_mode<synchronous>, transform_indices = @transform_3, window_bounds = array<i64: 3, 1, 128>}, {transform_indices = @transform_4, window_bounds = array<i64: 1, 8, 128>}]} {
    %c2_i32 = arith.constant 2 : i32
    %c0_i32 = arith.constant 0 : i32
    %0 = arith.cmpi eq, %c2_i32, %c0_i32 : i32
    %c1_i32 = arith.constant 1 : i32
    %1 = arith.select %0, %c1_i32, %c2_i32 : i32
    %2 = arith.remsi %arg1, %1 : i32
    %c0_i32_0 = arith.constant 0 : i32
    %3 = arith.cmpi ne, %2, %c0_i32_0 : i32
    %c0_i32_1 = arith.constant 0 : i32
    %4 = arith.cmpi slt, %2, %c0_i32_1 : i32
    %c0_i32_2 = arith.constant 0 : i32
    %5 = arith.cmpi slt, %1, %c0_i32_2 : i32
    %6 = arith.xori %4, %5 : i1
    %7 = arith.andi %6, %3 : i1
    %8 = arith.addi %2, %1 : i32
    %9 = arith.select %7, %8, %2 : i32
    %c0_i32_3 = arith.constant 0 : i32
    %10 = arith.cmpi eq, %arg1, %c0_i32_3 : i32
    %11 = arith.extui %10 : i1 to i32
    %c0_i32_4 = arith.constant 0 : i32
    %12 = arith.cmpi ne, %11, %c0_i32_4 : i32
    scf.if %12 {
      %c0_i32_65 = arith.constant 0 : i32
      %c0_i32_66 = arith.constant 0 : i32
      %c0_i32_67 = arith.constant 0 : i32
      %c0_i32_68 = arith.constant 0 : i32
      %85 = tpu.memref_slice %arg2[%arg0, %c0_i32_67, %c0_i32_68] : memref<2x16x384xbf16, #tpu.memory_space<any>> -> memref<1x16x256xbf16, #tpu.memory_space<any>>
      %86 = tpu.memref_squeeze %85 : memref<1x16x256xbf16, #tpu.memory_space<any>> -> memref<16x256xbf16, #tpu.memory_space<any>>
      %c0_i32_69 = arith.constant 0 : i32
      %c0_i32_70 = arith.constant 0 : i32
      %87 = tpu.memref_slice %arg7[%c0_i32_65, %c0_i32_69, %c0_i32_70] : memref<2x16x256xbf16, #tpu.memory_space<vmem>> -> memref<1x16x256xbf16, #tpu.memory_space<vmem>>
      %88 = tpu.memref_squeeze %87 : memref<1x16x256xbf16, #tpu.memory_space<vmem>> -> memref<16x256xbf16, #tpu.memory_space<vmem>>
      %89 = tpu.memref_slice %arg8[%c0_i32_66] : memref<2x!tpu.dma_semaphore, #tpu.memory_space<semaphore_mem>> -> memref<1x!tpu.dma_semaphore, #tpu.memory_space<semaphore_mem>>
      %90 = tpu.memref_squeeze %89 : memref<1x!tpu.dma_semaphore, #tpu.memory_space<semaphore_mem>> -> memref<!tpu.dma_semaphore, #tpu.memory_space<semaphore_mem>>
      tpu.enqueue_dma source(%86 : memref<16x256xbf16, #tpu.memory_space<any>>) target(%88 : memref<16x256xbf16, #tpu.memory_space<vmem>>) target_semaphore(%90 : memref<!tpu.dma_semaphore, #tpu.memory_space<semaphore_mem>>)
    } else {
    }
    %c0_i32_5 = arith.constant 0 : i32
    %c0_i32_6 = arith.constant 0 : i32
    %13 = tpu.memref_slice %arg2[%arg0, %c0_i32_5, %c0_i32_6] : memref<2x16x384xbf16, #tpu.memory_space<any>> -> memref<1x16x256xbf16, #tpu.memory_space<any>>
    %14 = tpu.memref_squeeze %13 : memref<1x16x256xbf16, #tpu.memory_space<any>> -> memref<16x256xbf16, #tpu.memory_space<any>>
    %c0_i32_7 = arith.constant 0 : i32
    %c0_i32_8 = arith.constant 0 : i32
    %15 = tpu.memref_slice %arg7[%9, %c0_i32_7, %c0_i32_8] : memref<2x16x256xbf16, #tpu.memory_space<vmem>> -> memref<1x16x256xbf16, #tpu.memory_space<vmem>>
    %16 = tpu.memref_squeeze %15 : memref<1x16x256xbf16, #tpu.memory_space<vmem>> -> memref<16x256xbf16, #tpu.memory_space<vmem>>
    %17 = tpu.memref_slice %arg8[%9] : memref<2x!tpu.dma_semaphore, #tpu.memory_space<semaphore_mem>> -> memref<1x!tpu.dma_semaphore, #tpu.memory_space<semaphore_mem>>
    %18 = tpu.memref_squeeze %17 : memref<1x!tpu.dma_semaphore, #tpu.memory_space<semaphore_mem>> -> memref<!tpu.dma_semaphore, #tpu.memory_space<semaphore_mem>>
    tpu.wait_dma2 semaphore(%18 : memref<!tpu.dma_semaphore, #tpu.memory_space<semaphore_mem>>) src(%14 : memref<16x256xbf16, #tpu.memory_space<any>>) dst(%16 : memref<16x256xbf16, #tpu.memory_space<vmem>>)
    %c1_i32_9 = arith.constant 1 : i32
    %19 = arith.addi %arg1, %c1_i32_9 : i32
    %c2_i32_10 = arith.constant 2 : i32
    %20 = arith.cmpi slt, %19, %c2_i32_10 : i32
    %21 = arith.extui %20 : i1 to i32
    %c0_i32_11 = arith.constant 0 : i32
    %22 = arith.cmpi ne, %21, %c0_i32_11 : i32
    scf.if %22 {
      %c1_i32_65 = arith.constant 1 : i32
      %85 = arith.addi %arg1, %c1_i32_65 : i32
      %c1_i32_66 = arith.constant 1 : i32
      %86 = arith.subi %c1_i32_66, %9 : i32
      %c128_i32 = arith.constant 128 : i32
      %87 = arith.muli %85, %c128_i32 : i32
      %c0_i32_67 = arith.constant 0 : i32
      %88 = tpu.memref_slice %arg2[%arg0, %c0_i32_67, %87] : memref<2x16x384xbf16, #tpu.memory_space<any>> -> memref<1x16x256xbf16, #tpu.memory_space<any>>
      %89 = tpu.memref_squeeze %88 : memref<1x16x256xbf16, #tpu.memory_space<any>> -> memref<16x256xbf16, #tpu.memory_space<any>>
      %c0_i32_68 = arith.constant 0 : i32
      %c0_i32_69 = arith.constant 0 : i32
      %90 = tpu.memref_slice %arg7[%86, %c0_i32_68, %c0_i32_69] : memref<2x16x256xbf16, #tpu.memory_space<vmem>> -> memref<1x16x256xbf16, #tpu.memory_space<vmem>>
      %91 = tpu.memref_squeeze %90 : memref<1x16x256xbf16, #tpu.memory_space<vmem>> -> memref<16x256xbf16, #tpu.memory_space<vmem>>
      %92 = tpu.memref_slice %arg8[%86] : memref<2x!tpu.dma_semaphore, #tpu.memory_space<semaphore_mem>> -> memref<1x!tpu.dma_semaphore, #tpu.memory_space<semaphore_mem>>
      %93 = tpu.memref_squeeze %92 : memref<1x!tpu.dma_semaphore, #tpu.memory_space<semaphore_mem>> -> memref<!tpu.dma_semaphore, #tpu.memory_space<semaphore_mem>>
      tpu.enqueue_dma source(%89 : memref<16x256xbf16, #tpu.memory_space<any>>) target(%91 : memref<16x256xbf16, #tpu.memory_space<vmem>>) target_semaphore(%93 : memref<!tpu.dma_semaphore, #tpu.memory_space<semaphore_mem>>)
    } else {
    }
    %c0_i32_12 = arith.constant 0 : i32
    %c0_i32_13 = arith.constant 0 : i32
    %23 = tpu.memref_slice %arg7[%9, %c0_i32_12, %c0_i32_13] : memref<2x16x256xbf16, #tpu.memory_space<vmem>> -> memref<1x16x256xbf16, #tpu.memory_space<vmem>>
    %24 = tpu.memref_squeeze %23 : memref<1x16x256xbf16, #tpu.memory_space<vmem>> -> memref<16x256xbf16, #tpu.memory_space<vmem>>
    %c0 = arith.constant 0 : index
    %c0_14 = arith.constant 0 : index
    %25 = vector.load %24[%c0, %c0_14] : memref<16x256xbf16, #tpu.memory_space<vmem>>, vector<16x128xbf16>
    %c0_15 = arith.constant 0 : index
    %c0_16 = arith.constant 0 : index
    %c0_17 = arith.constant 0 : index
    %26 = vector.load %arg5[%c0_15, %c0_16, %c0_17] : memref<3x1x128xbf16, #tpu.memory_space<vmem>>, vector<1x1x128xbf16>
    %27 = vector.shape_cast %26 : vector<1x1x128xbf16> to vector<1x128xbf16>
    %28 = vector.broadcast %27 : vector<1x128xbf16> to vector<16x128xbf16>
    %29 = arith.mulf %25, %28 : vector<16x128xbf16>
    %c0_i32_18 = arith.constant 0 : i32
    %c0_i32_19 = arith.constant 0 : i32
    %30 = tpu.memref_slice %arg7[%9, %c0_i32_18, %c0_i32_19] : memref<2x16x256xbf16, #tpu.memory_space<vmem>> -> memref<1x16x256xbf16, #tpu.memory_space<vmem>>
    %31 = tpu.memref_squeeze %30 : memref<1x16x256xbf16, #tpu.memory_space<vmem>> -> memref<16x256xbf16, #tpu.memory_space<vmem>>
    %c0_20 = arith.constant 0 : index
    %c1 = arith.constant 1 : index
    %32 = vector.load %31[%c0_20, %c1] : memref<16x256xbf16, #tpu.memory_space<vmem>>, vector<16x128xbf16>
    %c0_i32_21 = arith.constant 0 : i32
    %c0_i32_22 = arith.constant 0 : i32
    %33 = tpu.memref_slice %arg7[%9, %c0_i32_21, %c0_i32_22] : memref<2x16x256xbf16, #tpu.memory_space<vmem>> -> memref<1x16x256xbf16, #tpu.memory_space<vmem>>
    %34 = tpu.memref_squeeze %33 : memref<1x16x256xbf16, #tpu.memory_space<vmem>> -> memref<16x256xbf16, #tpu.memory_space<vmem>>
    %c0_23 = arith.constant 0 : index
    %c2 = arith.constant 2 : index
    %35 = vector.load %34[%c0_23, %c2] : memref<16x256xbf16, #tpu.memory_space<vmem>>, vector<16x128xbf16>
    %c2_24 = arith.constant 2 : index
    %c0_25 = arith.constant 0 : index
    %c0_26 = arith.constant 0 : index
    %36 = vector.load %arg5[%c2_24, %c0_25, %c0_26] : memref<3x1x128xbf16, #tpu.memory_space<vmem>>, vector<1x1x128xbf16>
    %37 = vector.shape_cast %36 : vector<1x1x128xbf16> to vector<1x128xbf16>
    %38 = vector.broadcast %37 : vector<1x128xbf16> to vector<16x128xbf16>
    %39 = arith.mulf %35, %38 : vector<16x128xbf16>
    %c0_i32_27 = arith.constant 0 : i32
    %c0_i32_28 = arith.constant 0 : i32
    %40 = tpu.memref_slice %arg7[%9, %c0_i32_27, %c0_i32_28] : memref<2x16x256xbf16, #tpu.memory_space<vmem>> -> memref<1x16x256xbf16, #tpu.memory_space<vmem>>
    %41 = tpu.memref_squeeze %40 : memref<1x16x256xbf16, #tpu.memory_space<vmem>> -> memref<16x256xbf16, #tpu.memory_space<vmem>>
    %c0_29 = arith.constant 0 : index
    %c16 = arith.constant 16 : index
    %42 = vector.load %41[%c0_29, %c16] : memref<16x256xbf16, #tpu.memory_space<vmem>>, vector<16x128xbf16>
    %c0_30 = arith.constant 0 : index
    %c0_31 = arith.constant 0 : index
    %c0_32 = arith.constant 0 : index
    %43 = vector.load %arg5[%c0_30, %c0_31, %c0_32] : memref<3x1x128xbf16, #tpu.memory_space<vmem>>, vector<1x1x128xbf16>
    %44 = vector.shape_cast %43 : vector<1x1x128xbf16> to vector<1x128xbf16>
    %45 = vector.broadcast %44 : vector<1x128xbf16> to vector<16x128xbf16>
    %46 = arith.mulf %42, %45 : vector<16x128xbf16>
    %c0_i32_33 = arith.constant 0 : i32
    %c0_i32_34 = arith.constant 0 : i32
    %47 = tpu.memref_slice %arg7[%9, %c0_i32_33, %c0_i32_34] : memref<2x16x256xbf16, #tpu.memory_space<vmem>> -> memref<1x16x256xbf16, #tpu.memory_space<vmem>>
    %48 = tpu.memref_squeeze %47 : memref<1x16x256xbf16, #tpu.memory_space<vmem>> -> memref<16x256xbf16, #tpu.memory_space<vmem>>
    %c0_35 = arith.constant 0 : index
    %c17 = arith.constant 17 : index
    %49 = vector.load %48[%c0_35, %c17] : memref<16x256xbf16, #tpu.memory_space<vmem>>, vector<16x128xbf16>
    %c0_i32_36 = arith.constant 0 : i32
    %c0_i32_37 = arith.constant 0 : i32
    %50 = tpu.memref_slice %arg7[%9, %c0_i32_36, %c0_i32_37] : memref<2x16x256xbf16, #tpu.memory_space<vmem>> -> memref<1x16x256xbf16, #tpu.memory_space<vmem>>
    %51 = tpu.memref_squeeze %50 : memref<1x16x256xbf16, #tpu.memory_space<vmem>> -> memref<16x256xbf16, #tpu.memory_space<vmem>>
    %c0_38 = arith.constant 0 : index
    %c18 = arith.constant 18 : index
    %52 = vector.load %51[%c0_38, %c18] : memref<16x256xbf16, #tpu.memory_space<vmem>>, vector<16x128xbf16>
    %c2_39 = arith.constant 2 : index
    %c0_40 = arith.constant 0 : index
    %c0_41 = arith.constant 0 : index
    %53 = vector.load %arg5[%c2_39, %c0_40, %c0_41] : memref<3x1x128xbf16, #tpu.memory_space<vmem>>, vector<1x1x128xbf16>
    %54 = vector.shape_cast %53 : vector<1x1x128xbf16> to vector<1x128xbf16>
    %55 = vector.broadcast %54 : vector<1x128xbf16> to vector<16x128xbf16>
    %56 = arith.mulf %52, %55 : vector<16x128xbf16>
    %c0_i32_42 = arith.constant 0 : i32
    %c0_i32_43 = arith.constant 0 : i32
    %57 = tpu.memref_slice %arg7[%9, %c0_i32_42, %c0_i32_43] : memref<2x16x256xbf16, #tpu.memory_space<vmem>> -> memref<1x16x256xbf16, #tpu.memory_space<vmem>>
    %58 = tpu.memref_squeeze %57 : memref<1x16x256xbf16, #tpu.memory_space<vmem>> -> memref<16x256xbf16, #tpu.memory_space<vmem>>
    %c0_44 = arith.constant 0 : index
    %c32 = arith.constant 32 : index
    %59 = vector.load %58[%c0_44, %c32] : memref<16x256xbf16, #tpu.memory_space<vmem>>, vector<16x128xbf16>
    %c0_45 = arith.constant 0 : index
    %c0_46 = arith.constant 0 : index
    %c0_47 = arith.constant 0 : index
    %60 = vector.load %arg5[%c0_45, %c0_46, %c0_47] : memref<3x1x128xbf16, #tpu.memory_space<vmem>>, vector<1x1x128xbf16>
    %61 = vector.shape_cast %60 : vector<1x1x128xbf16> to vector<1x128xbf16>
    %62 = vector.broadcast %61 : vector<1x128xbf16> to vector<16x128xbf16>
    %63 = arith.mulf %59, %62 : vector<16x128xbf16>
    %c0_i32_48 = arith.constant 0 : i32
    %c0_i32_49 = arith.constant 0 : i32
    %64 = tpu.memref_slice %arg7[%9, %c0_i32_48, %c0_i32_49] : memref<2x16x256xbf16, #tpu.memory_space<vmem>> -> memref<1x16x256xbf16, #tpu.memory_space<vmem>>
    %65 = tpu.memref_squeeze %64 : memref<1x16x256xbf16, #tpu.memory_space<vmem>> -> memref<16x256xbf16, #tpu.memory_space<vmem>>
    %c0_50 = arith.constant 0 : index
    %c33 = arith.constant 33 : index
    %66 = vector.load %65[%c0_50, %c33] : memref<16x256xbf16, #tpu.memory_space<vmem>>, vector<16x128xbf16>
    %c0_i32_51 = arith.constant 0 : i32
    %c0_i32_52 = arith.constant 0 : i32
    %67 = tpu.memref_slice %arg7[%9, %c0_i32_51, %c0_i32_52] : memref<2x16x256xbf16, #tpu.memory_space<vmem>> -> memref<1x16x256xbf16, #tpu.memory_space<vmem>>
    %68 = tpu.memref_squeeze %67 : memref<1x16x256xbf16, #tpu.memory_space<vmem>> -> memref<16x256xbf16, #tpu.memory_space<vmem>>
    %c0_53 = arith.constant 0 : index
    %c34 = arith.constant 34 : index
    %69 = vector.load %68[%c0_53, %c34] : memref<16x256xbf16, #tpu.memory_space<vmem>>, vector<16x128xbf16>
    %c2_54 = arith.constant 2 : index
    %c0_55 = arith.constant 0 : index
    %c0_56 = arith.constant 0 : index
    %70 = vector.load %arg5[%c2_54, %c0_55, %c0_56] : memref<3x1x128xbf16, #tpu.memory_space<vmem>>, vector<1x1x128xbf16>
    %71 = vector.shape_cast %70 : vector<1x1x128xbf16> to vector<1x128xbf16>
    %72 = vector.broadcast %71 : vector<1x128xbf16> to vector<16x128xbf16>
    %73 = arith.mulf %69, %72 : vector<16x128xbf16>
    %74 = tpu.concatenate %29, %32, %39, %46, %49, %56, %63, %66, %73 in 0 : vector<16x128xbf16>, vector<16x128xbf16>, vector<16x128xbf16>, vector<16x128xbf16>, vector<16x128xbf16>, vector<16x128xbf16>, vector<16x128xbf16>, vector<16x128xbf16>, vector<16x128xbf16> -> vector<144x128xbf16>
    %c0_57 = arith.constant 0 : index
    %c0_58 = arith.constant 0 : index
    %75 = vector.load %arg3[%c0_57, %c0_58] : memref<8x144xbf16, #tpu.memory_space<vmem>>, vector<8x144xbf16>
    %cst = arith.constant dense<0.000000e+00> : vector<8x128xf32>
    %76 = tpu.matmul %75, %74, %cst {dimension_numbers = #tpu.dot_dimension_numbers<[1], [0], [0], [1], [0, 0, 1, 1], [], []>} : vector<8x144xbf16>, vector<144x128xbf16>, vector<8x128xf32> -> vector<8x128xf32>
    %c0_59 = arith.constant 0 : index
    %c0_60 = arith.constant 0 : index
    %77 = vector.load %arg4[%c0_59, %c0_60] : memref<8x1xf32, #tpu.memory_space<vmem>>, vector<8x1xf32>
    %78 = vector.broadcast %77 : vector<8x1xf32> to vector<8x128xf32>
    %79 = arith.addf %76, %78 : vector<8x128xf32>
    %cst_61 = arith.constant 0.000000e+00 : f32
    %80 = vector.broadcast %cst_61 : f32 to vector<8x128xf32>
    %81 = arith.maximumf %79, %80 : vector<8x128xf32>
    %c0_62 = arith.constant 0 : index
    %c0_63 = arith.constant 0 : index
    %c0_64 = arith.constant 0 : index
    %82 = vector.load %arg6[%c0_62, %c0_63, %c0_64] : memref<1x8x128xf32, #tpu.memory_space<vmem>>, vector<1x8x128xf32>
    %83 = vector.shape_cast %82 : vector<1x8x128xf32> to vector<8x128xf32>
    %84 = vector.shape_cast %81 : vector<8x128xf32> to vector<1x8x128xf32>
    tpu.vector_store %arg6[%c0_62, %c0_63, %c0_64], %84 {strides = array<i32>} : memref<1x8x128xf32, #tpu.memory_space<vmem>>, vector<1x8x128xf32>,
    return
  }
  func.func @transform_1(%arg0: i32, %arg1: i32) -> (i32, i32) {
    %c0_i32 = arith.constant 0 : i32
    %c0_i32_0 = arith.constant 0 : i32
    %c0_i32_1 = arith.constant 0 : i32
    return %c0_i32, %c0_i32_0 : i32, i32
  }
  func.func @transform_2(%arg0: i32, %arg1: i32) -> (i32, i32) {
    %c0_i32 = arith.constant 0 : i32
    %c0_i32_0 = arith.constant 0 : i32
    %c0_i32_1 = arith.constant 0 : i32
    return %c0_i32, %c0_i32_0 : i32, i32
  }
  func.func @transform_3(%arg0: i32, %arg1: i32) -> (i32, i32, i32) {
    %c0_i32 = arith.constant 0 : i32
    %c0_i32_0 = arith.constant 0 : i32
    %c0_i32_1 = arith.constant 0 : i32
    %c0_i32_2 = arith.constant 0 : i32
    return %c0_i32, %c0_i32_0, %c0_i32_1 : i32, i32, i32
  }
  func.func @transform_4(%arg0: i32, %arg1: i32) -> (i32, i32, i32) {
    %c0_i32 = arith.constant 0 : i32
    %c0_i32_0 = arith.constant 0 : i32
    return %arg0, %c0_i32, %arg1 : i32, i32, i32
  }
}

</mosaic_0001>

<bundles_post_ra>
// kernel: tpu_custom_call.1
= control target key start
LH: loop header
LB: loop body
LE: loop exit
PB: predicated region body
PF: predicated region fallthrough
CT: control target
= control target key end

     0   :  { %9 = vsyncpa [#allocation6], 0  ;;  %s1194_s0 = inlined_call_operand.hbm [shape: bf16[2,16,384], index: 0, kind: input, shape index: {}]   ;;  %s1195_s1 = inlined_call_operand.vmem [shape: bf16[8,144], index: 1, kind: input, shape index: {}]   ;;  %s1196_s2 = inlined_call_operand.vmem [shape: f32[8,1], index: 2, kind: input, shape index: {}]   ;;  %s1197_s3 = inlined_call_operand.vmem [shape: bf16[3,1,128], index: 3, kind: input, shape index: {}]   ;;  %s1198_s4 = inlined_call_operand.hbm [shape: f32[2,8,256], index: 4, kind: output, shape index: {}]  }
   0x1   :  { %11 = vsyncpa [#allocation6 + $0x1], 0  ;;  %s900_s15 = smov 0   ;;  %s902_s16 = smov 0  }
   0x2   :  { %s904_s17 = smov 0   ;;  %s906_s18 = smov 0  }
   0x3   :  { %s908_s19 = smov 0   ;;  %s910_s20 = smov 0  }
   0x4   :  { %s912_s21 = smov 0   ;;  %s914_s22 = smov 0  }
   0x5 LB: > { %1209 = sst [smem:[#allocation11_spill]] %s846_s20  ;;  %s559_s23 = sadd.s32 4294967295, %s854_s22   ;;  %s854_s22 = sphi %s914_s22, %s17_s22   ;;  %s850_s21 = sphi %s912_s21, %s1230_s21   ;;  %s846_s20 = sphi %s910_s20, %s1229_s20   ;;  %s842_s19 = sphi %s908_s19, %s1228_s19   ;;  %s838_s18 = sphi %s906_s18, %s1227_s18   ;;  %s834_s17 = sphi %s904_s17, %s1233_s17   ;;  %s830_s16 = sphi %s902_s16, %s1232_s16   ;;  %s826_s15 = sphi %s900_s15, %s1231_s15  }
   0x6   : > { %1210 = sst [smem:[#allocation12_spill]] %s850_s21  ;;  %s560_s24 = sadd.s32 4294967294, %s854_s22  }
   0x7   : > { %s26_s25 = sadd.s32 1, %s846_s20  ;;  %s29_s26 = sadd.s32 1, %s850_s21 }
   0x8   : > { %p27_p0 = scmp.ge.s32.totalorder %s26_s25, 2  ;;  %p111_p1 = scmp.ne.s32.totalorder %s834_s17, %s830_s16 }
   0x9   : > { %p112_p2 = scmp.eq.s32.totalorder %s559_s23, 3  ;;  %p117_p5 = scmp.ne.s32.totalorder %s830_s16, %s826_s15 }
   0xa   : > { %s1235_s25 = smov (%p27_p0, %s26_s25), 0  ;;  %s1237_s26 = smov (!%p27_p0, %s29_s26), %s850_s21 }
   0xb   : > { %1211 = sst [smem:[#allocation13_spill]] %s1235_s25  ;;  %s97_s27 = ssub.s32 %s846_s20, %s1235_s25 }
   0xc   : > { %p951_p3 = por %p112_p2, %p111_p1  ;;  %p31_p4 = scmp.ge.s32.totalorder %s1237_s26, 2 }
   0xd   : > { %p118_p6 = scmp.eq.s32.totalorder %s560_s24, 3  ;;  %p562_p7 = scmp.ge.s32.totalorder %s854_s22, 1 }
   0xe   : > { %s1239_s26 = smov (%p31_p4, %s1237_s26), 0  ;;  %p145_p9 = scmp.lt.s32.totalorder %s854_s22, 5 }
   0xf   : > { %1213 = sst [smem:[#allocation14_spill]] %s1239_s26  ;;  %p960_p8 = por %p118_p6, %p117_p5 }
  0x10   : > { %s96_s30 = ssub.s32 %s850_s21, %s1239_s26  ;;  %s101_s5 = sadd.s32 1, %s834_s17 }
  0x11   : > { %s1214_s29 = scalar_select %p960_p8, 1, 0 }
  0x12   : > { %s98_s6 = sor.u32 %s97_s27, %s96_s30  ;;  %p146_p10 = pnand %p562_p7, %p145_p9 }
  0x13   : > { %p99_p11 = scmp.eq.s32.totalorder %s98_s6, 0  ;;  %s1199_s8 = sand.u32 (!%p146_p10), 1, %s830_s16  }
  0x14   : > { %149 = sbr.rel (%p146_p10) target bundleno = 564 (0x234), region = 32  ;;  %p165_p12 = scmp.lt.s32.totalorder (!%p146_p10), %s838_s18, 0 }
  0x15   : > { %s969_s7 = scalar_select %p99_p11, %s834_s17, %s101_s5  }
  0x16   : > { %s975_s9 = sshll.u32 (!%p146_p10), %s1199_s8, 3  ;;  %s166_s10 = ssub.s32 (!%p146_p10), 0, %s838_s18 }
  0x17   : > { %1215 = sst [smem:[#allocation15_spill]] %s969_s7  ;;  %s564_s11 = smin.u32 (!%p146_p10), %s838_s18, %s166_s10 }
  0x18   : > { %s168_s12 = sand.u32 (!%p146_p10), 1, %s564_s11   ;;  %p617_p13 = scmp.eq.s32.totalorder (!%p146_p10), %s838_s18, 0 }
  0x19   : > { %s169_s13 = ssub.s32 0, %s168_s12  ;;  %s602_s14 = smul.u32 384, %s842_s19 }
  0x1a   : > { %s1241_s13 = smov (!%p165_p12, %s169_s13), %s168_s12  ;;  %s856_s5 = smov [#allocation2]  }
  0x1b   : > { %p566_p0 = scmp.lt.s32.totalorder %s1241_s13, 0  ;;  %s175_s23 = sadd.s32 2, %s1241_s13 }
  0x1c   : > { %s984_s30 = scalar_lea.hbm %s1194_s0, %s602_s14  ;;  %s185_s6 = sshll.u32 %s856_s5, 4  ;;  %s988_s6 = int_to_ptr.vmem [resolvable:$true] %s185_s6 }
  0x1d   : > { %s1243_s23 = smov (!%p566_p0, %s175_s23), %s1241_s13  ;;  %s708_s10 = scalar_lea.hbm %s984_s30, 256 }
  0x1e   : > { %p709_p1 = scmp.ne.s32.totalorder %s984_s30, %s708_s10  ;;  %s1202_s24 = scalar_lea.hbm %s1194_s0, 768 }
  0x1f   : > { %p713_p5 = scmp.lt.s32.totalorder %s984_s30, %s1194_s0  ;;  %p714_p6 = scmp.lt.s32.totalorder %s1202_s24, %s708_s10 }
  0x20   : > { %p710_p2 = pnand %p709_p1, %p617_p13 }
  0x21   : > { %p715_p7 = por %p714_p6, %p713_p5 }
  0x22   : > { %p711_p4 = pneg %p710_p2 }
  0x24   : > { %p716_p9 = pnand %p715_p7, %p711_p4 }
  0x26   : > { %719 = shalt.err (!%p716_p9)  }
  0x27   : > { %s720_s13 = scalar_lea.vmem %s988_s6, 256  ;;  %s1201_s5 = scalar_lea.vmem %s988_s6, 512 }
  0x28   : > { %p721_p10 = scmp.ne.s32.totalorder %s988_s6, %s720_s13  ;;  %p727_p0 = scmp.lt.s32.totalorder %s988_s6, %s988_s6 }
  0x29   : > { %p728_p1 = scmp.lt.s32.totalorder %s1201_s5, %s720_s13 }
  0x2a   : > { %p722_p11 = pnand %p721_p10, %p617_p13 }
  0x2b   : > { %p729_p2 = por %p728_p1, %p727_p0 }
  0x2c   : > { %p723_p12 = pneg %p722_p11 }
  0x2e   : > { %p730_p5 = pnand %p729_p2, %p723_p12 }
  0x30   : > { %733 = shalt.err (!%p730_p5)  }
  0x31   : > { %s1203_s26 = smov 192   ;;  %s1204_s8 = smov 128  }
  0x32   : > { %s1205_s10 = smov 8   ;;  %s603_s11 = sshll.u32 %s1243_s23, 4 }
  0x33   : > { %608 = dma.hbm_to_vmem [thread:$0]  (%p617_p13), %s984_s30, 256, %s988_s6, [#allocation3], %s1203_s26, %s1204_s8, %s1205_s10 }
  0x34   : > { %s1023_s14 = scalar_lea.vmem [#allocation2], %s603_s11  ;;  %s192_s27 = scalar_lea.sflag [#allocation3], %s1243_s23 }
  0x35   : > { %818 = dma.done.wait %s192_s27, 256 }
  0x36   : > { %819 = vsyncadd %s192_s27, 4294967040  ;;  %v225_v0 = vlaneseq  ;;  %s197_s13 = sadd.s32 1, %s838_s18  ;;  %s202_s24 = ssub.s32 1, %s1243_s23  ;;  %v221_v3 = vld [vmem:[%s1197_s3] sm:$0x1] }
  0x37   : > { %p1027_p4 = scmp.lt.s32.totalorder %s197_s13, 2  ;;  %s604_s30 = sshll.u32 %s838_s18, 7  ;;  %v577_v4 = vld [vmem:[%s1197_s3 + $0x2] sm:$0x1]  ;;  %v223_v5 = vpack.i.b16 %v221_v3, %v221_v3 }
  0x38   : > { %v226_v1 = vshrl.u32 %v225_v0, 7  ;;  %s605_s26 = sadd.s32 128, %s604_s30  ;;  %s206_s12 = smul.u32 6, %s842_s19  ;;  %v240_v6 = vpack.i.b16 %v577_v4, %v577_v4 }
  0x39   : > { %s204_s11 = sshra.s32 %s605_s26, 7  ;;  %s606_s8 = sshll.u32 %s202_s24, 4 }
  0x3a   : > { %v227_v2 = vsub.s32 0, %v226_v1  ;;  %s207_s13 = sadd.s32 %s206_s12, %s204_s11  ;;  %s212_s26 = scalar_lea.vmem [#allocation2], %s606_s8 }
  0x3b   : > { %s573_s20 = sshll.u32 %s207_s13, 6  ;;  %s215_s10 = sshll.u32 %s212_s26, 4  ;;  %s216_s10 = int_to_ptr.vmem [resolvable:$true] %s215_s10 }
  0x3c   : > { %s1043_s30 = scalar_lea.hbm %s1194_s0, %s573_s20  ;;  %v228_v7 = vrot.slane %v223_v5, %v227_v2  ;;  %v245_v8 = vrot.slane %v240_v6, %v227_v2  ;;  %s213_s27 = scalar_lea.sflag [#allocation3], %s202_s24 }
  0x3d   : > { %s734_s21 = scalar_lea.hbm %s1043_s30, 256  ;;  %p739_p9 = scmp.lt.s32.totalorder %s1043_s30, %s1194_s0 }
  0x3e   : > { %p735_p13 = scmp.ne.s32.totalorder %s1043_s30, %s734_s21  ;;  %s1217_s11 = scalar_lea.hbm %s1194_s0, 768 }
  0x3f   : > { %p740_p10 = scmp.lt.s32.totalorder %s1217_s11, %s734_s21 }
  0x40   : > { %p736_p6 = pnand %p735_p13, %p1027_p4 }
  0x41   : > { %p741_p11 = por %p740_p10, %p739_p9 }
  0x42   : > { %p737_p7 = pneg %p736_p6 }
  0x44   : > { %p742_p12 = pnand %p741_p11, %p737_p7 }
  0x46   : > { %745 = shalt.err (!%p742_p12)  }
  0x47   : > { %s746_s8 = scalar_lea.vmem %s216_s10, 256  ;;  %p753_p5 = scmp.lt.s32.totalorder %s216_s10, %s988_s6 }
  0x48   : > { %p747_p0 = scmp.ne.s32.totalorder %s216_s10, %s746_s8  ;;  %s1218_s24 = scalar_lea.vmem %s988_s6, 512 }
  0x49   : > { %p754_p13 = scmp.lt.s32.totalorder %s1218_s24, %s746_s8 }
  0x4a   : > { %p748_p1 = pnand %p747_p0, %p1027_p4 }
  0x4b   : > { %p755_p6 = por %p754_p13, %p753_p5 }
  0x4c   : > { %p749_p2 = pneg %p748_p1 }
  0x4e   : > { %p756_p8 = pnand %p755_p6, %p749_p2 }
  0x50   : > { %759 = shalt.err (!%p756_p8)  }
  0x51   : > { %s1219_s13 = smov 8   ;;  %s1220_s23 = smov 128   ;;  %v1068_v9 = vcombine.low %v228_v7, %v228_v7  ;;  %v578_v10 = vcombine.low %v245_v8, %v245_v8  ;;  %v866_v15 = vmov 0   ;;  %vm276_vm0 = vcmask 261120   ;;  %v1106_v50 = vld [vmem:[%s1195_s1] sm:$0xff] }
  0x52   : > { %s1221_s26 = smov 192   ;;  %s860_s21 = smov 32   ;;  %416 = vmatprep.subr.bf16.mxu0 %v866_v15  ;;  %702 = vset.pattern.permute.xlu1 %v866_v15  ;;  %vm268_vm1 = vcmask 146432   ;;  %vm260_vm2 = vcmask 130048   ;;  %vm381_vm3 = vcmask 777216   ;;  %vm252_vm4 = vcmask 15360  }
  0x53   : > { %610 = dma.hbm_to_vmem [thread:$0]  (%p1027_p4), %s1043_s30, 256, %s216_s10, %s213_s27, %s1221_s26, %s1220_s23, %s1219_s13  ;;  %703 = vset.pattern.permute.xlu0 %v866_v15  ;;  %vm284_vm5 = vcmask 277504   ;;  %v593_v53 = vcombine.high %v1106_v50, %v1106_v50  ;;  %vm374_vm6 = vcmask 785408   ;;  %vm359_vm7 = vcmask 900096  }
  0x54   : > { %273 = vrot.lane.b32.xlu0 %v1068_v9, %s860_s21  ;;  %s861_s6 = smov 16   ;;  %s862_s25 = smov 18   ;;  %v1073_v11 = vld [vmem:[%s1023_s14] sm:$0xff]  ;;  %v1076_v12 = vld [vmem:[%s1023_s14 + $0x8] sm:$0xff]  ;;  %vm344_vm8 = vcmask 908288   ;;  %vm337_vm9 = vcmask 916480  }
  0x55   : > { %257 = vrot.lane.b32.xlu1 %v1068_v9, %s861_s6  ;;  %s863_s12 = smov 2   ;;  %v1080_v13 = vcombine.low %v1073_v11, %v1076_v12  ;;  %s864_s5 = smov 34   ;;  %v1084_v14 = vcombine.high %v1073_v11, %v1076_v12  ;;  %594 = vmatprep.mubr.msk.bf16.mxu0 %vm260_vm2, %v593_v53  ;;  %v400_v56 = vld [vmem:[%s1196_s2] sm:$0xff]  ;;  %vm322_vm10 = vcmask 1031168   ;;  %v220_v6 = vld [vmem:[%s1023_s14 + $0x8] sm:$0xf] }
  0x56   : > { %s865_s30 = smov 95   ;;  %s867_s10 = smov 96   ;;  %v219_v5 = vld [vmem:[%s1023_s14] sm:$0xf]  ;;  %vm307_vm11 = vcmask 1039360   ;;  %vm396_vm12 = vcmask 769024  }
  0x57   : > { %s868_s27 = smov 110   ;;  %s869_s20 = smov 111  }
  0x58   : > { %265 = vrot.lane.b32.xlu0 %v578_v10, %s862_s25  ;;  %s870_s7 = smov 112   ;;  %s871_s24 = smov 126  }
  0x59   : > { %249 = vrot.lane.b32.xlu1 %v578_v10, %s863_s12  ;;  %s872_s13 = smov 127   ;;  %s873_s23 = smov 94  }
  0x5a   : > { %s596_s14 = sshll.u32 %s842_s19, 1  ;;  %s1222_s12 = scalar_lea.vmem [#allocation5], %s975_s9 }
  0x5b   : > { %s470_s6 = sadd.s32 %s838_s18, %s596_s14  ;;  %s1223_s18 = smov %s1222_s12 }
  0x5c   : > { %281 = vrot.lane.b32.xlu0 %v578_v10, %s864_s5  ;;  %s597_s25 = sshll.u32 %s470_s6, 7  ;;  %s474_s5 = sshll.u32 %s1222_s12, 4  ;;  %s1140_s5 = int_to_ptr.vmem [resolvable:$true] %s474_s5 }
  0x5d   : > { %377 = vrot.lane.b32.xlu1 %v1080_v13, %s865_s30  ;;  %s1224_s19 = sand.u32 1, %s830_s16   ;;  %s874_s11 = smov [#allocation5]  }
  0x5e   : > { %s764_s8 = sshll.u32 %s874_s11, 4  ;;  %s765_s8 = int_to_ptr.vmem [resolvable:$false] %s764_s8 }
  0x5f   : > { %p767_p9 = scmp.lt.s32.totalorder %s1140_s5, %s765_s8 }
  0x60   : > { %379 = vrot.lane.b32.xlu0 %v1084_v14, %s865_s30 }
  0xc6   : > { %v274_v16 = vpop.permute.xlu0 %273 }
  0xc7   : > { %v258_v17 = vpop.permute.xlu1 %257  ;;  %v275_v18 = vrot.slane %v274_v16, 4 }
  0xc8   : > { %v259_v28 = vrot.slane %v258_v17, 4 }
  0xc9   : > { %v277_v19 = vsel %vm276_vm0, %v275_v18, %v274_v16 }
  0xca   : > { %v279_v20 = vmul.bf16 %v277_v19, %v1073_v11  ;;  %v280_v21 = vmul.bf16 %v277_v19, %v1076_v12  ;;  %v266_v22 = vpop.permute.xlu0 %265  ;;  %v261_v35 = vsel %vm260_vm2, %v259_v28, %v258_v17 }
  0xcb   : > { %v267_v23 = vrot.slane %v266_v22, 4  ;;  %v250_v26 = vpop.permute.xlu1 %249  ;;  %v263_v39 = vmul.bf16 %v261_v35, %v1073_v11  ;;  %v264_v40 = vmul.bf16 %v261_v35, %v1076_v12 }
  0xcc   : > { %v589_v24 = vcombine.high %v279_v20, %v280_v21  ;;  %v588_v25 = vcombine.low %v279_v20, %v280_v21  ;;  %v251_v36 = vrot.slane %v250_v26, 4 }
  0xcd   : > { %v269_v27 = vsel %vm268_vm1, %v267_v23, %v266_v22  ;;  %v585_v45 = vcombine.high %v263_v39, %v264_v40  ;;  %v584_v46 = vcombine.low %v263_v39, %v264_v40 }
  0xce   : > { %v271_v29 = vmul.bf16 %v269_v27, %v1073_v11  ;;  %v272_v30 = vmul.bf16 %v269_v27, %v1076_v12  ;;  %372 = vrot.lane.b32.xlu0 %v589_v24, %s867_s10  ;;  %370 = vrot.lane.b32.xlu1 %v588_v25, %s867_s10  ;;  %v282_v31 = vpop.permute.xlu0 %281  ;;  %v253_v41 = vsel %vm252_vm4, %v251_v36, %v250_v26 }
  0xcf   : > { %v378_v34 = vpop.permute.xlu1 %377  ;;  %v283_v42 = vrot.slane %v282_v31, 4  ;;  %v255_v43 = vmul.bf16 %v253_v41, %v1073_v11  ;;  %v256_v44 = vmul.bf16 %v253_v41, %v1076_v12 }
  0xd0   : > { %v587_v32 = vcombine.high %v271_v29, %v272_v30  ;;  %v586_v33 = vcombine.low %v271_v29, %v272_v30 }
  0xd1   : > { %v285_v47 = vsel %vm284_vm5, %v283_v42, %v282_v31  ;;  %v583_v48 = vcombine.high %v255_v43, %v256_v44  ;;  %v582_v49 = vcombine.low %v255_v43, %v256_v44 }
  0xd2   : > { %357 = vrot.lane.b32.xlu0 %v587_v32, %s868_s27  ;;  %355 = vrot.lane.b32.xlu1 %v586_v33, %s868_s27  ;;  %v380_v37 = vpop.permute.xlu0 %379  ;;  %v287_v51 = vmul.bf16 %v285_v47, %v1073_v11  ;;  %v288_v52 = vmul.bf16 %v285_v47, %v1076_v12  ;;  %v233_v11 = vmul.bf16 %v1068_v9, %v219_v5  ;;  %s1138_s27 = scalar_lea.hbm %s1198_s4, %s597_s25 }
  0xd3   : > { %v382_v38 = vsel %vm381_vm3, %v378_v34, %v380_v37  ;;  %v234_v12 = vmul.bf16 %v1068_v9, %v220_v6  ;;  %v592_v9 = vcombine.low %v1106_v50, %v1106_v50 }
  0xd4   : > { %417 = vmatpush1.bf16.msra.mxu0 %v382_v38  ;;  %v591_v54 = vcombine.high %v287_v51, %v288_v52  ;;  %v590_v55 = vcombine.low %v287_v51, %v288_v52 }
  0xd5   : > { %418 = vmatprep.subr.bf16.mxu0 %v866_v15  ;;  %v579_v17 = vcombine.low %v233_v11, %v234_v12 }
  0xd6   : > { %342 = vrot.lane.b32.xlu0 %v1084_v14, %s869_s20  ;;  %340 = vrot.lane.b32.xlu1 %v1080_v13, %s869_s20  ;;  %s459_s20 = scalar_lea.sflag [#allocation6], %s1224_s19 }
  0xda   : > { %335 = vrot.lane.b32.xlu0 %v585_v45, %s870_s7  ;;  %333 = vrot.lane.b32.xlu1 %v584_v46, %s870_s7  ;;  %s760_s7 = scalar_lea.vmem %s1140_s5, 128 }
  0xdb   : > { %p761_p8 = scmp.ne.s32.totalorder %s1140_s5, %s760_s7 }
  0xdd   : > { %p762_p4 = pnand %p761_p8, %p951_p3 }
  0xde   : > { %320 = vrot.lane.b32.xlu0 %v583_v48, %s871_s24  ;;  %318 = vrot.lane.b32.xlu1 %v582_v49, %s871_s24  ;;  %s766_s24 = scalar_lea.vmem %s765_s8, 256 }
  0xdf   : > { %p763_p7 = pneg %p762_p4  ;;  %p768_p10 = scmp.lt.s32.totalorder %s766_s24, %s760_s7 }
  0xe1   : > { %p769_p11 = por %p768_p10, %p767_p9 }
  0xe2   : > { %305 = vrot.lane.b32.xlu0 %v1084_v14, %s872_s13  ;;  %303 = vrot.lane.b32.xlu1 %v1080_v13, %s872_s13 }
  0xe3   : > { %p770_p12 = pnand %p769_p11, %p763_p7 }
  0xe6   : > { %394 = vrot.lane.b32.xlu0 %v591_v54, %s873_s23  ;;  %392 = vrot.lane.b32.xlu1 %v590_v55, %s873_s23 }
  0xea   : > { %403 = vperm.xlu1 %702, %v400_v56  }
 0x140   : > { %v373_v57 = vpop.permute.xlu0 %372  ;;  %v371_v58 = vpop.permute.xlu1 %370 }
 0x141   : > { %v375_v59 = vsel %vm374_vm6, %v371_v58, %v373_v57 }
 0x142   : > { %419 = vmatpush1.bf16.msra.mxu0 %v375_v59 }
 0x143   : > { %420 = vmatprep.subr.bf16.mxu0 %v866_v15 }
 0x144   : > { %v358_v60 = vpop.permute.xlu0 %357  ;;  %v356_v61 = vpop.permute.xlu1 %355 }
 0x145   : > { %v360_v62 = vsel %vm359_vm7, %v356_v61, %v358_v60 }
 0x146   : > { %421 = vmatpush1.bf16.msra.mxu0 %v360_v62 }
 0x147   : > { %422 = vmatprep.subr.bf16.mxu0 %v866_v15 }
 0x148   : > { %v343_v63 = vpop.permute.xlu0 %342  ;;  %v341_v0 = vpop.permute.xlu1 %340 }
 0x149   : > { %v345_v1 = vsel %vm344_vm8, %v341_v0, %v343_v63 }
 0x14a   : > { %423 = vmatpush1.bf16.msra.mxu0 %v345_v1 }
 0x14b   : > { %424 = vmatprep.subr.bf16.mxu0 %v866_v15 }
 0x14c   : > { %v336_v2 = vpop.permute.xlu0 %335  ;;  %v334_v3 = vpop.permute.xlu1 %333 }
 0x14d   : > { %v338_v4 = vsel %vm337_vm9, %v334_v3, %v336_v2 }
 0x14e   : > { %425 = vmatpush1.bf16.msra.mxu0 %v338_v4 }
 0x14f   : > { %426 = vmatprep.subr.bf16.mxu0 %v866_v15 }
 0x150   : > { %v321_v7 = vpop.permute.xlu0 %320  ;;  %v319_v8 = vpop.permute.xlu1 %318 }
 0x151   : > { %v323_v10 = vsel %vm322_vm10, %v319_v8, %v321_v7 }
 0x152   : > { %427 = vmatpush1.bf16.msra.mxu0 %v323_v10 }
 0x153   : > { %428 = vmatprep.subr.bf16.mxu0 %v866_v15 }
 0x154   : > { %v306_v13 = vpop.permute.xlu0 %305  ;;  %v304_v14 = vpop.permute.xlu1 %303 }
 0x155   : > { %v308_v16 = vsel %vm307_vm11, %v304_v14, %v306_v13 }
 0x156   : > { %429 = vmatpush1.bf16.msra.mxu0 %v308_v16 }
 0x157   : > { %430 = vmatprep.subr.bf16.mxu0 %v866_v15 }
 0x158   : > { %v395_v18 = vpop.permute.xlu0 %394  ;;  %v393_v19 = vpop.permute.xlu1 %392 }
 0x159   : > { %v397_v20 = vsel %vm396_vm12, %v393_v19, %v395_v18 }
 0x15a   : > { %431 = vmatpush1.bf16.msra.mxu0 %v579_v17 }
 0x15b   : > { %446 = vmatprep.subr.bf16.mxu0 %v866_v15 }
 0x15e   : > { %447 = vmatpush2.bf16.msra.mxu0 %v397_v20 }
 0x161   : > { %449 = vmatmul.mubr.bf16.vlgmr.msra.gmra.mxu0 %v592_v9 }
 0x165   : > { %v404_v21 = vpop.permute.xlu1 %403 }
 0x221   : > { %v450_v22 = vpop.f32.mrf.mxu0 }
 0x222   : > { %v451_v23 = vadd.f32 %v450_v22, %v404_v21 }
 0x223   : > { %v452_v24 = vpop.f32.mrf.mxu0 }
 0x224   : > { %v456_v25 = vmax.f32 %v451_v23, 0.0 }
 0x225   : > { %v453_v15 = vpop.f32.mrf.mxu0 }
 0x226   : > { %457 = vst [vmem:[%s1223_s18] sm:$0xff] %v456_v25 }
 0x227   : > { %v454_v26 = vpop.f32.mrf.mxu0 }
 0x228   : > { %773 = shalt.err (!%p770_p12)
}
 0x229   : > { %s774_s9 = scalar_lea.hbm %s1138_s27, 128  ;;  %s778_s26 = scalar_lea.hbm %s1198_s4, 512 }
 0x22a   : > { %p775_p0 = scmp.ne.s32.totalorder %s1138_s27, %s774_s9  ;;  %p779_p5 = scmp.lt.s32.totalorder %s1138_s27, %s1198_s4 }
 0x22b   : > { %p780_p13 = scmp.lt.s32.totalorder %s778_s26, %s774_s9 }
 0x22c   : > { %p776_p1 = pnand %p775_p0, %p951_p3 }
 0x22d   : > { %p781_p6 = por %p780_p13, %p779_p5 }
 0x22e   : > { %p777_p2 = pneg %p776_p1 }
 0x230   : > { %p782_p8 = pnand %p781_p6, %p777_p2 }
 0x232   : > { %785 = shalt.err (!%p782_p8)
}
 0x233   : > { %611 = dma.vmem_to_hbm [thread:$0]  (%p951_p3), %s1140_s5, 128, %s1138_s27, %s459_s20  }
 0x234 PF: > { %p619_p4 = scmp.ge.s32.totalorder %s854_s22, 2  ;;  %s486_s6 = sand.u32 1, %s826_s15  }
 0x235   : > { %p1225_p7 = scmp.ne.s32.totalorder %s1214_s29, 0  ;;  %s487_s25 = scalar_lea.sflag [#allocation6], %s486_s6 }
 0x237   : > { %p614_p9 = pnand %p619_p4, %p1225_p7 }
 0x239   : > { %p615_p10 = pneg %p614_p9 }
 0x23b   : > { %821 = dma.done.wait (%p615_p10), %s487_s25, 128  }
 0x23c   : > { %823 = vsyncadd (%p615_p10), %s487_s25, 4294967168  ;;  %s17_s22 = sadd.s32 1, %s854_s22   ;;  %s1226_s28 = sld [smem:[#allocation15_spill]] }
 0x23d   : > { %p14_p11 = scmp.ge.s32.totalorder %s17_s22, 6   ;;  %s1227_s18 = sld [smem:[#allocation11_spill]] }
 0x23e   : > { %s1228_s19 = sld [smem:[#allocation12_spill]]  ;;  %s1231_s15 = smov %s830_s16 }
 0x23f   : > { %s1229_s20 = sld [smem:[#allocation13_spill]]  ;;  %s1232_s16 = smov %s834_s17 }
 0x240   : > { %s1230_s21 = sld [smem:[#allocation14_spill]]  ;;  %16 = sbr.rel (!%p14_p11) target bundleno = 5 (0x5), region = 80 }
 0x242   : > { %s1233_s17 = smov %s1226_s28 }
 0x245   :  { %492 = vsyncpa [#allocation6], 1 }
 0x246   :  { %494 = vsyncpa [#allocation6 + $0x1], 1 }
 0x247   :  { %495 = vsyncmov [#allocation3] }
 0x24a   :  { %s496_s29 = vpop.sfrf %495 }
 0x24b   :  { %p600_p3 = scmp.ne.s32.totalorder %s496_s29, 0 }
 0x24d   :  { %500 = shalt.err (%p600_p3)  }
 0x24e   :  { %502 = vsyncmov [#allocation3 + $0x1] }
 0x251   :  { %s503_s12 = vpop.sfrf %502 }
 0x252   :  { %p601_p12 = scmp.ne.s32.totalorder %s503_s12, 0 }
 0x254   :  { %507 = shalt.err (%p601_p12)  }

</bundles_post_ra>
